<compile_context>
chip_gen: v7x
topology: tpu7x:2x2x1
jax: 0.10.0
libtpu: 0.0.40
codegen_flags: <defaults>
</compile_context>

<pallas_src>
import math

import jax
import jax.numpy as jnp
from jax.experimental import pallas as pl
from jax.experimental.pallas import tpu as pltpu


def _dnn_kernel(x_ref, w1_ref, b1_ref, w2_ref, b2_ref, o_ref):
    """Fused Linear -> ReLU -> Linear on one row tile.

    x_ref  : [TM, D_in]   f32  (cast to bf16 in-kernel for the MXU)
    w1_ref : [D_in, H]    bf16
    b1_ref : [1, H]       f32
    w2_ref : [H, D_out]   bf16
    b2_ref : [1, D_out]   f32
    o_ref  : [TM, D_out]  f32
    """
    # Cast on the VPU (hidden under DMA) instead of a separate XLA pass.
    x = x_ref[...].astype(w1_ref.dtype)
    # First Linear: bf16 MXU matmul, f32 accumulation + bias.
    h = jnp.dot(x, w1_ref[...], preferred_element_type=jnp.float32)
    h = h + b1_ref[...]
    # ReLU (VPU).
    h = jnp.maximum(h, 0.0)
    # Second Linear: bf16 operands for the MXU, f32 accumulation + bias.
    y = jnp.dot(h.astype(w2_ref.dtype), w2_ref[...],
                preferred_element_type=jnp.float32)
    y = y + b2_ref[...]
    o_ref[...] = y.astype(o_ref.dtype)


def prepare_params(params):
    """One-time prep: bf16 weights for the MXU, f32 2-D biases.

    Do this once (e.g. right after init), NOT on every forward call, so the
    per-call path never re-reads/re-writes the weights in HBM for a cast.
    """
    W1, b1, W2, b2 = params
    return (W1.astype(jnp.bfloat16),
            b1.reshape(1, -1).astype(jnp.float32),
            W2.astype(jnp.bfloat16),
            b2.reshape(1, -1).astype(jnp.float32))


def _pick_row_tile(batch, tile_m):
    """Row tile: as large as requested, but keep >=2 grid steps when B > 8
    so v7x's two TensorCores can both be used (harmless on v5e/v6e)."""
    if batch <= 8:
        return batch                      # full-extent block, single step
    half = -(-batch // 2)                 # cdiv(B, 2)
    half = -(-half // 8) * 8              # round up to the 8-sublane granule
    return min(tile_m, half)


def dnn_forward(x, prepared_params, *, tile_m=512):
    """Full DNN forward: relu(x @ W1 + b1) @ W2 + b2, one fused Pallas call."""
    W1_bf, b1_2d, W2_bf, b2_2d = prepared_params
    B, D_in = x.shape
    H = W1_bf.shape[1]
    D_out = W2_bf.shape[1]

    TM = _pick_row_tile(B, tile_m)
    grid = (pl.cdiv(B, TM),)              # partial last tile is fine (no pad)

    # Explicit scoped-VMEM budget: double-buffered x/out tiles + resident
    # (double-buffered) weights, with headroom. Clamped so it is safe on every
    # generation (v5e default scoped limit is 16 MiB; v7x physical is 64 MiB).
    vmem_needed = (
        2 * TM * D_in * 4                       # x tiles (f32, double buffer)
        + 2 * TM * D_out * 4                    # out tiles (f32, double buffer)
        + 2 * (D_in * H + H * D_out) * 2        # bf16 weights (double buffer)
        + 2 * (H + D_out) * 4                   # biases
    )
    vmem_limit = int(min(max(4 * vmem_needed, 16 << 20), 48 << 20))

    return pl.pallas_call(
        _dnn_kernel,
        out_shape=jax.ShapeDtypeStruct((B, D_out), jnp.float32),
        grid=grid,
        in_specs=[
            pl.BlockSpec((TM, D_in), lambda i: (i, 0)),   # x row tile (f32)
            pl.BlockSpec((D_in, H), lambda i: (0, 0)),    # W1 (resident)
            pl.BlockSpec((1, H), lambda i: (0, 0)),       # b1
            pl.BlockSpec((H, D_out), lambda i: (0, 0)),   # W2 (resident)
            pl.BlockSpec((1, D_out), lambda i: (0, 0)),   # b2
        ],
        out_specs=pl.BlockSpec((TM, D_out), lambda i: (i, 0)),
        compiler_params=pltpu.CompilerParams(
            dimension_semantics=("parallel",),            # shard rows over TCs
            vmem_limit_bytes=vmem_limit,
        ),
    )(x, W1_bf, b1_2d, W2_bf, b2_2d)


def init_dnn_params(key, input_dim, hidden_dim, output_dim):
    """PyTorch-nn.Linear-style uniform init (forward semantics only)."""
    k1, k2, k3, k4 = jax.random.split(key, 4)
    lim1 = 1.0 / math.sqrt(input_dim)
    lim2 = 1.0 / math.sqrt(hidden_dim)
    W1 = jax.random.uniform(k1, (input_dim, hidden_dim),
                            minval=-lim1, maxval=lim1, dtype=jnp.float32)
    b1 = jax.random.uniform(k2, (hidden_dim,),
                            minval=-lim1, maxval=lim1, dtype=jnp.float32)
    W2 = jax.random.uniform(k3, (hidden_dim, output_dim),
                            minval=-lim2, maxval=lim2, dtype=jnp.float32)
    b2 = jax.random.uniform(k4, (output_dim,),
                            minval=-lim2, maxval=lim2, dtype=jnp.float32)
    return (W1, b1, W2, b2)


if __name__ == "__main__":
    # Small, deterministic example shapes consistent with the module.
    BATCH = 256
    INPUT_DIM = 64
    HIDDEN_DIM = 128
    OUTPUT_DIM = 32

    key = jax.random.PRNGKey(0)
    k_x, k_p = jax.random.split(key)

    x = jax.random.normal(k_x, (BATCH, INPUT_DIM), dtype=jnp.float32)
    params = init_dnn_params(k_p, INPUT_DIM, HIDDEN_DIM, OUTPUT_DIM)
    prepared = prepare_params(params)     # one-time bf16 weight prep

    out = dnn_forward(x, prepared, tile_m=512)
    out = jax.block_until_ready(out)

    # Pure-JAX f32 reference (tolerance accounts for bf16 MXU operands).
    W1, b1, W2, b2 = params
    ref = jnp.maximum(x @ W1 + b1, 0.0) @ W2 + b2

    assert out.shape == (BATCH, OUTPUT_DIM)
    assert bool(jnp.all(jnp.isfinite(out)))
    assert bool(jnp.allclose(out, ref, rtol=5e-2, atol=5e-2))
    print("KERNEL_OK")
</pallas_src>

<mosaic_0001>
module attributes {stable_mosaic.version = 11 : i64} {
  func.func @_dnn_kernel(%arg0: i32, %arg1: memref<128x64xf32, #tpu.memory_space<vmem>>, %arg2: memref<64x128xbf16, #tpu.memory_space<vmem>>, %arg3: memref<1x128xf32, #tpu.memory_space<vmem>>, %arg4: memref<128x32xbf16, #tpu.memory_space<vmem>>, %arg5: memref<1x32xf32, #tpu.memory_space<vmem>>, %arg6: memref<128x32xf32, #tpu.memory_space<vmem>>) attributes {dimension_semantics = [#tpu.dimension_semantics<parallel>], iteration_bounds = array<i64: 2>, scalar_prefetch = 0 : i64, scratch_operands = 0 : i64, tpu.core_type = #tpu.core_type<tc>, window_params = [{transform_indices = @transform_0, window_bounds = array<i64: 128, 64>}, {pipeline_mode = #tpu.pipeline_mode<synchronous>, transform_indices = @transform_1, window_bounds = array<i64: 64, 128>}, {pipeline_mode = #tpu.pipeline_mode<synchronous>, transform_indices = @transform_2, window_bounds = array<i64: 1, 128>}, {pipeline_mode = #tpu.pipeline_mode<synchronous>, transform_indices = @transform_3, window_bounds = array<i64: 128, 32>}, {pipeline_mode = #tpu.pipeline_mode<synchronous>, transform_indices = @transform_4, window_bounds = array<i64: 1, 32>}, {transform_indices = @transform_5, window_bounds = array<i64: 128, 32>}]} {
    %c0 = arith.constant 0 : index
    %c0_0 = arith.constant 0 : index
    %0 = vector.load %arg1[%c0, %c0_0] : memref<128x64xf32, #tpu.memory_space<vmem>>, vector<128x64xf32>
    %1 = arith.truncf %0 : vector<128x64xf32> to vector<128x64xbf16>
    %c0_1 = arith.constant 0 : index
    %c0_2 = arith.constant 0 : index
    %2 = vector.load %arg2[%c0_1, %c0_2] : memref<64x128xbf16, #tpu.memory_space<vmem>>, vector<64x128xbf16>
    %cst = arith.constant dense<0.000000e+00> : vector<128x128xf32>
    %3 = tpu.matmul %1, %2, %cst {dimension_numbers = #tpu.dot_dimension_numbers<[1], [0], [0], [1], [0, 0, 1, 1], [], []>} : vector<128x64xbf16>, vector<64x128xbf16>, vector<128x128xf32> -> vector<128x128xf32>
    %c0_3 = arith.constant 0 : index
    %c0_4 = arith.constant 0 : index
    %4 = vector.load %arg3[%c0_3, %c0_4] : memref<1x128xf32, #tpu.memory_space<vmem>>, vector<1x128xf32>
    %5 = vector.broadcast %4 : vector<1x128xf32> to vector<128x128xf32>
    %6 = arith.addf %3, %5 : vector<128x128xf32>
    %cst_5 = arith.constant 0.000000e+00 : f32
    %7 = vector.broadcast %cst_5 : f32 to vector<128x128xf32>
    %8 = arith.maximumf %6, %7 : vector<128x128xf32>
    %9 = arith.truncf %8 : vector<128x128xf32> to vector<128x128xbf16>
    %c0_6 = arith.constant 0 : index
    %c0_7 = arith.constant 0 : index
    %10 = vector.load %arg4[%c0_6, %c0_7] : memref<128x32xbf16, #tpu.memory_space<vmem>>, vector<128x32xbf16>
    %cst_8 = arith.constant dense<0.000000e+00> : vector<128x32xf32>
    %11 = tpu.matmul %9, %10, %cst_8 {dimension_numbers = #tpu.dot_dimension_numbers<[1], [0], [0], [1], [0, 0, 1, 1], [], []>} : vector<128x128xbf16>, vector<128x32xbf16>, vector<128x32xf32> -> vector<128x32xf32>
    %c0_9 = arith.constant 0 : index
    %c0_10 = arith.constant 0 : index
    %12 = vector.load %arg5[%c0_9, %c0_10] : memref<1x32xf32, #tpu.memory_space<vmem>>, vector<1x32xf32>
    %13 = vector.broadcast %12 : vector<1x32xf32> to vector<128x32xf32>
    %14 = arith.addf %11, %13 : vector<128x32xf32>
    %c0_11 = arith.constant 0 : index
    %c0_12 = arith.constant 0 : index
    %15 = vector.load %arg6[%c0_11, %c0_12] : memref<128x32xf32, #tpu.memory_space<vmem>>, vector<128x32xf32>
    tpu.vector_store %arg6[%c0_11, %c0_12], %14 {strides = array<i32>} : memref<128x32xf32, #tpu.memory_space<vmem>>, vector<128x32xf32>,
    return
  }
  func.func @transform_0(%arg0: i32) -> (i32, i32) {
    %c0_i32 = arith.constant 0 : i32
    %c0_i32_0 = arith.constant 0 : i32
    return %arg0, %c0_i32 : i32, i32
  }
  func.func @transform_1(%arg0: i32) -> (i32, i32) {
    %c0_i32 = arith.constant 0 : i32
    %c0_i32_0 = arith.constant 0 : i32
    %c0_i32_1 = arith.constant 0 : i32
    return %c0_i32, %c0_i32_0 : i32, i32
  }
  func.func @transform_2(%arg0: i32) -> (i32, i32) {
    %c0_i32 = arith.constant 0 : i32
    %c0_i32_0 = arith.constant 0 : i32
    %c0_i32_1 = arith.constant 0 : i32
    return %c0_i32, %c0_i32_0 : i32, i32
  }
  func.func @transform_3(%arg0: i32) -> (i32, i32) {
    %c0_i32 = arith.constant 0 : i32
    %c0_i32_0 = arith.constant 0 : i32
    %c0_i32_1 = arith.constant 0 : i32
    return %c0_i32, %c0_i32_0 : i32, i32
  }
  func.func @transform_4(%arg0: i32) -> (i32, i32) {
    %c0_i32 = arith.constant 0 : i32
    %c0_i32_0 = arith.constant 0 : i32
    %c0_i32_1 = arith.constant 0 : i32
    return %c0_i32, %c0_i32_0 : i32, i32
  }
  func.func @transform_5(%arg0: i32) -> (i32, i32) {
    %c0_i32 = arith.constant 0 : i32
    %c0_i32_0 = arith.constant 0 : i32
    return %arg0, %c0_i32 : i32, i32
  }
}

</mosaic_0001>

<bundles_post_ra>
// kernel: tpu_custom_call.1
= control target key start
LH: loop header
LB: loop body
LE: loop exit
PB: predicated region body
PF: predicated region fallthrough
CT: control target
= control target key end

     0   :  { %s870_s18 = smov 0   ;;  %s996_s0 = inlined_call_operand.vmem [shape: f32[256,64], index: 0, kind: input, shape index: {}]   ;;  %s997_s1 = inlined_call_operand.vmem [shape: bf16[64,128], index: 1, kind: input, shape index: {}]   ;;  %s998_s2 = inlined_call_operand.vmem [shape: f32[1,128], index: 2, kind: input, shape index: {}]   ;;  %s999_s3 = inlined_call_operand.vmem [shape: bf16[128,32], index: 3, kind: input, shape index: {}]   ;;  %s1000_s4 = inlined_call_operand.vmem [shape: f32[1,32], index: 4, kind: input, shape index: {}]   ;;  %s1001_s5 = inlined_call_operand.vmem [shape: f32[256,32], index: 5, kind: output, shape index: {}]  }
   0x1 LB: > { %s679_s19 = sadd.s32 4294967295, %s838_s18   ;;  %p683_p0 = scmp.ge.s32.totalorder %s838_s18, 1  ;;  %s838_s18 = sphi %s870_s18, %s15_s18  }
   0x2   : > { %p188_p1 = scmp.lt.s32.totalorder %s838_s18, 3 }
   0x4   : > { %p189_p2 = pnand %p683_p0, %p188_p1 }
   0x5   : > { %v820_v0 = vld [vmem:[%s997_s1] sm:$0xff] (!%p189_p2)   ;;  %s684_s22 = sshll.u32 (!%p189_p2), %s679_s19, 4  ;;  %v821_v1 = vld [vmem:[%s997_s1 + $0x8] sm:$0xff] (!%p189_p2)   ;;  %v822_v2 = vld [vmem:[%s997_s1 + $0x10] sm:$0xff] (!%p189_p2)   ;;  %vm292_vm0 = vcmask (!%p189_p2), 523264   ;;  %vm606_vm1 = vcmask (!%p189_p2), 261120  }
   0x6   : > { %192 = sbr.rel (%p189_p2) target bundleno = 486 (0x1e6), region = 40  ;;  %p217_p3 = scmp.lt.s32.totalorder (!%p189_p2), %s684_s22, 31  ;;  %740 = vmatprep.subr.bf16.mxu0 (!%p189_p2), %v820_v0  ;;  %v824_v3 = vld [vmem:[%s999_s3] sm:$0xff] (!%p189_p2)   ;;  %v825_v4 = vld [vmem:[%s999_s3 + $0x8] sm:$0xff] (!%p189_p2)   ;;  %v823_v7 = vld [vmem:[%s997_s1 + $0x18] sm:$0xff] (!%p189_p2)  }
   0x7   : > { %741 = vmatpush3.bf16.msra.mxu0 (!%p189_p2), %v820_v0  ;;  %796 = vmatprep.subr.bf16.mxu1 (!%p189_p2), %v824_v3  ;;  %v826_v9 = vld [vmem:[%s999_s3 + $0x10] sm:$0xff] (!%p189_p2)   ;;  %v827_v15 = vld [vmem:[%s999_s3 + $0x18] sm:$0xff] (!%p189_p2)   ;;  %v828_v19 = vld [vmem:[%s999_s3 + $0x20] sm:$0xff] (!%p189_p2)  }
   0x8   : > { %742 = vmatprep.subr.bf16.mxu0 (!%p189_p2), %v821_v1  ;;  %804 = vmatpush3.bf16.msra.mxu1 (!%p189_p2), %v824_v3  ;;  %v829_v24 = vld [vmem:[%s999_s3 + $0x28] sm:$0xff] (!%p189_p2)   ;;  %v830_v34 = vld [vmem:[%s999_s3 + $0x30] sm:$0xff] (!%p189_p2)   ;;  %v831_v35 = vld [vmem:[%s999_s3 + $0x38] sm:$0xff] (!%p189_p2)  }
   0x9   : > { %797 = vmatprep.subr.bf16.mxu1 (!%p189_p2), %v825_v4  ;;  %v688_v36 = vld [vmem:[%s998_s2] ss:$0 sm:$0xff] (!%p189_p2) }
   0xb   : > { %743 = vmatpush3.bf16.msra.mxu0 (!%p189_p2), %v821_v1 }
   0xc   : > { %744 = vmatprep.subr.bf16.mxu0 (!%p189_p2), %v822_v2  ;;  %805 = vmatpush3.bf16.msra.mxu1 (!%p189_p2), %v825_v4 }
   0xd   : > { %s1003_s22 = smov (!%p217_p3, %s684_s22), 31  ;;  %798 = vmatprep.subr.bf16.mxu1 %v826_v9 }
   0xe   : > { %s685_s29 = sshll.u32 %s1003_s22, 3 }
   0xf   : > { %s898_s7 = scalar_lea.vmem %s996_s0, %s685_s29  ;;  %745 = vmatpush3.bf16.msra.mxu0 %v822_v2  ;;  %s959_s8 = scalar_lea.vmem %s1001_s5, %s685_s29 }
  0x10   : > { %v229_v5 = vld [vmem:[%s898_s7] sm:$0xff]  ;;  %v230_v6 = vld [vmem:[%s898_s7 + $0x8] sm:$0xff]  ;;  %v231_v10 = vld [vmem:[%s898_s7 + $0x10] sm:$0xff]  ;;  %746 = vmatprep.subr.bf16.mxu0 %v823_v7  ;;  %806 = vmatpush3.bf16.msra.mxu1 %v826_v9 }
  0x11   : > { %v245_v8 = vpack.c.bf16 %v230_v6, %v229_v5  ;;  %v232_v11 = vld [vmem:[%s898_s7 + $0x18] sm:$0xff]  ;;  %v233_v12 = vld [vmem:[%s898_s7 + $0x20] sm:$0xff]  ;;  %v234_v13 = vld [vmem:[%s898_s7 + $0x28] sm:$0xff]  ;;  %799 = vmatprep.subr.bf16.mxu1 %v827_v15 }
  0x12   : > { %v246_v14 = vpack.c.bf16 %v232_v11, %v231_v10  ;;  %v247_v16 = vpack.c.bf16 %v234_v13, %v233_v12  ;;  %v235_v17 = vld [vmem:[%s898_s7 + $0x30] sm:$0xff]  ;;  %v236_v18 = vld [vmem:[%s898_s7 + $0x38] sm:$0xff]  ;;  %v237_v20 = vld [vmem:[%s898_s7 + $0x40] sm:$0xff] }
  0x13   : > { %748 = vmatprep.mubr.msk.bf16.mxu0 %vm292_vm0, %v245_v8  ;;  %747 = vmatpush3.bf16.msra.mxu0 %v823_v7  ;;  %v238_v21 = vld [vmem:[%s898_s7 + $0x48] sm:$0xff]  ;;  %v248_v22 = vpack.c.bf16 %v236_v18, %v235_v17  ;;  %v239_v25 = vld [vmem:[%s898_s7 + $0x50] sm:$0xff]  ;;  %v240_v26 = vld [vmem:[%s898_s7 + $0x58] sm:$0xff] }
  0x14   : > { %764 = vmatprep.subr.bf16.mxu0 %v824_v3  ;;  %807 = vmatpush3.bf16.msra.mxu1 %v827_v15  ;;  %v249_v23 = vpack.c.bf16 %v238_v21, %v237_v20  ;;  %v241_v27 = vld [vmem:[%s898_s7 + $0x60] sm:$0xff]  ;;  %v242_v28 = vld [vmem:[%s898_s7 + $0x68] sm:$0xff]  ;;  %v250_v29 = vpack.c.bf16 %v240_v26, %v239_v25  ;;  %v243_v31 = vld [vmem:[%s898_s7 + $0x70] sm:$0xff] }
  0x15   : > { %800 = vmatprep.subr.bf16.mxu1 %v828_v19  ;;  %v251_v30 = vpack.c.bf16 %v242_v28, %v241_v27  ;;  %v244_v32 = vld [vmem:[%s898_s7 + $0x78] sm:$0xff] }
  0x16   : > { %749 = vmatmul.mubr.msk.bf16.vlgmr.msra.gmra.mrb[0].mxu0 %vm292_vm0, %v246_v14  ;;  %v252_v33 = vpack.c.bf16 %v244_v32, %v243_v31 }
  0x17   : > { %752 = vmatprep.mubr.msk.bf16.mxu0 %vm292_vm0, %v247_v16  ;;  %765 = vmatpush3.bf16.msra.mxu0 %v824_v3 }
  0x18   : > { %766 = vmatprep.subr.bf16.mxu0 %v825_v4  ;;  %808 = vmatpush3.bf16.msra.mxu1 %v828_v19 }
  0x19   : > { %801 = vmatprep.subr.bf16.mxu1 %v829_v24 }
  0x1b   : > { %767 = vmatpush3.bf16.msra.mxu0 %v825_v4 }
  0x1c   : > { %768 = vmatprep.subr.bf16.mxu0 %v826_v9  ;;  %809 = vmatpush3.bf16.msra.mxu1 %v829_v24 }
  0x1d   : > { %802 = vmatprep.subr.bf16.mxu1 %v830_v34 }
  0x1e   : > { %753 = vmatmul.mubr.msk.bf16.gmra.mrb[4].mxu0 %vm292_vm0, %v248_v22 }
  0x1f   : > { %756 = vmatprep.mubr.msk.bf16.mxu0 %vm292_vm0, %v249_v23  ;;  %769 = vmatpush3.bf16.msra.mxu0 %v826_v9 }
  0x20   : > { %770 = vmatprep.subr.bf16.mxu0 %v827_v15  ;;  %810 = vmatpush3.bf16.msra.mxu1 %v830_v34 }
  0x21   : > { %803 = vmatprep.subr.bf16.mxu1 %v831_v35 }
  0x23   : > { %771 = vmatpush3.bf16.msra.mxu0 %v827_v15 }
  0x24   : > { %772 = vmatprep.subr.bf16.mxu0 %v828_v19  ;;  %811 = vmatpush3.bf16.msra.mxu1 %v831_v35 }
  0x26   : > { %757 = vmatmul.mubr.msk.bf16.gmra.mrb[8].mxu0 %vm292_vm0, %v250_v29  ;;  %v701_v29 = vld [vmem:[%s1000_s4] ss:$0 sm:$0xff] }
  0x27   : > { %760 = vmatprep.mubr.msk.bf16.mxu0 %vm292_vm0, %v251_v30  ;;  %773 = vmatpush3.bf16.msra.mxu0 %v828_v19 }
  0x28   : > { %774 = vmatprep.subr.bf16.mxu0 %v829_v24 }
  0x2b   : > { %775 = vmatpush3.bf16.msra.mxu0 %v829_v24 }
  0x2c   : > { %776 = vmatprep.subr.bf16.mxu0 %v830_v34 }
  0x2e   : > { %761 = vmatmul.mubr.msk.bf16.gmra.mrb[12].mxu0 %vm292_vm0, %v252_v33 }
  0x2f   : > { %777 = vmatpush3.bf16.msra.mxu0 %v830_v34 }
  0x30   : > { %778 = vmatprep.subr.bf16.mxu0 %v831_v35 }
  0x33   : > { %779 = vmatpush3.bf16.msra.mxu0 %v831_v35 }
  0xe9   : > { %v750_v37 = vpop.f32.mrb[0].mxu0 }
  0xea   : > { %v360_v38 = vadd.f32 %v750_v37, %v688_v36  ;;  %v351_v39 = vpop.f32.mrb[1].mxu0 }
  0xeb   : > { %v352_v40 = vadd.f32 %v688_v36, %v351_v39  ;;  %v751_v41 = vpop.f32.mrb[2].mxu0 }
  0xec   : > { %v363_v42 = vadd.f32 %v751_v41, %v688_v36  ;;  %v354_v43 = vpop.f32.mrb[3].mxu0  ;;  %v416_v45 = vmax.f32 %v360_v38, 0.0 }
  0xed   : > { %v355_v44 = vadd.f32 %v688_v36, %v354_v43  ;;  %v414_v47 = vmax.f32 %v352_v40, 0.0 }
  0xee   : > { %v417_v46 = vmax.f32 %v363_v42, 0.0 }
  0xef   : > { %v415_v48 = vmax.f32 %v355_v44, 0.0 }
  0xf0   : > { %v431_v49 = vpack.c.bf16 %v417_v46, %v416_v45 }
  0xf1   : > { %v430_v50 = vpack.c.bf16 %v415_v48, %v414_v47  ;;  %v754_v51 = vpop.f32.mrb[4].mxu0 }
  0xf2   : > { %v376_v52 = vadd.f32 %v754_v51, %v688_v36  ;;  %v367_v53 = vpop.f32.mrb[5].mxu0 }
  0xf3   : > { %v368_v54 = vadd.f32 %v688_v36, %v367_v53  ;;  %v755_v55 = vpop.f32.mrb[6].mxu0  ;;  %780 = vmatprep.mubr.bf16.mxu0 %v430_v50 }
  0xf4   : > { %v379_v56 = vadd.f32 %v755_v55, %v688_v36  ;;  %v370_v57 = vpop.f32.mrb[7].mxu0  ;;  %781 = vmatmul.mubr.bf16.vlgmr.msra.gmra.mrb[16].mxu0 %v431_v49  ;;  %v420_v59 = vmax.f32 %v376_v52, 0.0 }
  0xf5   : > { %v371_v58 = vadd.f32 %v688_v36, %v370_v57  ;;  %v418_v61 = vmax.f32 %v368_v54, 0.0 }
  0xf6   : > { %v421_v60 = vmax.f32 %v379_v56, 0.0 }
  0xf7   : > { %v419_v62 = vmax.f32 %v371_v58, 0.0 }
  0xf8   : > { %v433_v63 = vpack.c.bf16 %v421_v60, %v420_v59 }
  0xf9   : > { %v758_v0 = vpop.f32.mrb[8].mxu0  ;;  %v432_v1 = vpack.c.bf16 %v419_v62, %v418_v61 }
  0xfa   : > { %v392_v2 = vadd.f32 %v758_v0, %v688_v36  ;;  %v383_v3 = vpop.f32.mrb[9].mxu0 }
  0xfb   : > { %v384_v4 = vadd.f32 %v688_v36, %v383_v3  ;;  %v759_v5 = vpop.f32.mrb[10].mxu0  ;;  %784 = vmatprep.mubr.bf16.mxu1 %v432_v1 }
  0xfc   : > { %v395_v6 = vadd.f32 %v759_v5, %v688_v36  ;;  %v386_v7 = vpop.f32.mrb[11].mxu0  ;;  %785 = vmatmul.mubr.bf16.vlgmr.msra.gmra.mrb[0].mxu1 %v433_v63  ;;  %v424_v9 = vmax.f32 %v392_v2, 0.0 }
  0xfd   : > { %v387_v8 = vadd.f32 %v688_v36, %v386_v7  ;;  %v422_v11 = vmax.f32 %v384_v4, 0.0 }
  0xfe   : > { %v425_v10 = vmax.f32 %v395_v6, 0.0 }
  0xff   : > { %v423_v12 = vmax.f32 %v387_v8, 0.0 }
 0x100   : > { %v435_v13 = vpack.c.bf16 %v425_v10, %v424_v9 }
 0x101   : > { %v434_v14 = vpack.c.bf16 %v423_v12, %v422_v11  ;;  %v762_v15 = vpop.f32.mrb[12].mxu0 }
 0x102   : > { %v408_v16 = vadd.f32 %v762_v15, %v688_v36  ;;  %v399_v17 = vpop.f32.mrb[13].mxu0 }
 0x103   : > { %v400_v18 = vadd.f32 %v688_v36, %v399_v17  ;;  %v763_v19 = vpop.f32.mrb[14].mxu0  ;;  %788 = vmatprep.mubr.bf16.mxu1 %v434_v14 }
 0x104   : > { %v411_v20 = vadd.f32 %v763_v19, %v688_v36  ;;  %v402_v21 = vpop.f32.mrb[15].mxu0  ;;  %789 = vmatmul.mubr.bf16.gmra.mrb[4].mxu1 %v435_v13  ;;  %v428_v23 = vmax.f32 %v408_v16, 0.0 }
 0x105   : > { %v403_v22 = vadd.f32 %v688_v36, %v402_v21  ;;  %v426_v25 = vmax.f32 %v400_v18, 0.0 }
 0x106   : > { %v429_v24 = vmax.f32 %v411_v20, 0.0 }
 0x107   : > { %v427_v26 = vmax.f32 %v403_v22, 0.0 }
 0x108   : > { %v437_v27 = vpack.c.bf16 %v429_v24, %v428_v23 }
 0x109   : > { %v436_v28 = vpack.c.bf16 %v427_v26, %v426_v25 }
 0x10b   : > { %792 = vmatprep.mubr.bf16.mxu1 %v436_v28 }
 0x10c   : > { %793 = vmatmul.mubr.bf16.gmra.mrb[8].mxu1 %v437_v27 }
 0x1c7   : > { %v782_v30 = vpop.f32.mrb[16].mxu0 }
 0x1c8   : > { %v552_v31 = vadd.f32 %v782_v30, %v701_v29  ;;  %v543_v32 = vpop.f32.mrb[17].mxu0 }
 0x1c9   : > { %v544_v33 = vadd.f32 %v701_v29, %v543_v32  ;;  %v783_v34 = vpop.f32.mrb[18].mxu0 }
 0x1ca   : > { %609 = vst.msk [vmem:[%s959_s8 + $0x10] sm:$0xff] %vm606_vm1, %v552_v31  ;;  %v555_v35 = vadd.f32 %v783_v34, %v701_v29  ;;  %v546_v36 = vpop.f32.mrb[19].mxu0 }
 0x1cb   : > { %607 = vst.msk [vmem:[%s959_s8] sm:$0xff] %vm606_vm1, %v544_v33  ;;  %v547_v37 = vadd.f32 %v701_v29, %v546_v36 }
 0x1cc   : > { %610 = vst.msk [vmem:[%s959_s8 + $0x18] sm:$0xff] %vm606_vm1, %v555_v35 }
 0x1cd   : > { %608 = vst.msk [vmem:[%s959_s8 + $0x8] sm:$0xff] %vm606_vm1, %v547_v37 }
 0x1cf   : > { %v786_v38 = vpop.f32.mrb[0].mxu1 }
 0x1d0   : > { %v568_v39 = vadd.f32 %v786_v38, %v701_v29  ;;  %v559_v40 = vpop.f32.mrb[1].mxu1 }
 0x1d1   : > { %v560_v41 = vadd.f32 %v701_v29, %v559_v40  ;;  %v787_v42 = vpop.f32.mrb[2].mxu1 }
 0x1d2   : > { %613 = vst.msk [vmem:[%s959_s8 + $0x30] sm:$0xff] %vm606_vm1, %v568_v39  ;;  %v571_v43 = vadd.f32 %v787_v42, %v701_v29  ;;  %v562_v44 = vpop.f32.mrb[3].mxu1 }
 0x1d3   : > { %611 = vst.msk [vmem:[%s959_s8 + $0x20] sm:$0xff] %vm606_vm1, %v560_v41  ;;  %v563_v45 = vadd.f32 %v701_v29, %v562_v44 }
 0x1d4   : > { %614 = vst.msk [vmem:[%s959_s8 + $0x38] sm:$0xff] %vm606_vm1, %v571_v43 }
 0x1d5   : > { %612 = vst.msk [vmem:[%s959_s8 + $0x28] sm:$0xff] %vm606_vm1, %v563_v45 }
 0x1d7   : > { %v790_v46 = vpop.f32.mrb[4].mxu1 }
 0x1d8   : > { %v584_v47 = vadd.f32 %v790_v46, %v701_v29  ;;  %v575_v48 = vpop.f32.mrb[5].mxu1 }
 0x1d9   : > { %v576_v49 = vadd.f32 %v701_v29, %v575_v48  ;;  %v791_v50 = vpop.f32.mrb[6].mxu1 }
 0x1da   : > { %617 = vst.msk [vmem:[%s959_s8 + $0x50] sm:$0xff] %vm606_vm1, %v584_v47  ;;  %v587_v51 = vadd.f32 %v791_v50, %v701_v29  ;;  %v578_v52 = vpop.f32.mrb[7].mxu1 }
 0x1db   : > { %615 = vst.msk [vmem:[%s959_s8 + $0x40] sm:$0xff] %vm606_vm1, %v576_v49  ;;  %v579_v53 = vadd.f32 %v701_v29, %v578_v52 }
 0x1dc   : > { %618 = vst.msk [vmem:[%s959_s8 + $0x58] sm:$0xff] %vm606_vm1, %v587_v51 }
 0x1dd   : > { %616 = vst.msk [vmem:[%s959_s8 + $0x48] sm:$0xff] %vm606_vm1, %v579_v53 }
 0x1df   : > { %v794_v54 = vpop.f32.mrb[8].mxu1 }
 0x1e0   : > { %v600_v55 = vadd.f32 %v794_v54, %v701_v29  ;;  %v591_v56 = vpop.f32.mrb[9].mxu1 }
 0x1e1   : > { %v592_v57 = vadd.f32 %v701_v29, %v591_v56  ;;  %v795_v58 = vpop.f32.mrb[10].mxu1 }
 0x1e2   : > { %621 = vst.msk [vmem:[%s959_s8 + $0x70] sm:$0xff] %vm606_vm1, %v600_v55  ;;  %v603_v59 = vadd.f32 %v795_v58, %v701_v29  ;;  %v594_v60 = vpop.f32.mrb[11].mxu1 }
 0x1e3   : > { %619 = vst.msk [vmem:[%s959_s8 + $0x60] sm:$0xff] %vm606_vm1, %v592_v57  ;;  %v595_v61 = vadd.f32 %v701_v29, %v594_v60 }
 0x1e4   : > { %622 = vst.msk [vmem:[%s959_s8 + $0x78] sm:$0xff] %vm606_vm1, %v603_v59 }
 0x1e5   : > { %620 = vst.msk [vmem:[%s959_s8 + $0x68] sm:$0xff] %vm606_vm1, %v595_v61 }
 0x1e6 PF: > { %s15_s18 = sadd.s32 1, %s838_s18  }
 0x1e7   : > { %p12_p4 = scmp.ge.s32.totalorder %s15_s18, 4  }
 0x1e9   :  { %14 = sbr.rel (!%p12_p4) target bundleno = 1 (0x1), region = 70 }

</bundles_post_ra>
